<compile_context>
chip_gen: v6e
topology: v6e:2x2x1
jax: 0.10.0
libtpu: 0.0.40
codegen_flags: <defaults>
</compile_context>

<pallas_src>
import functools

import jax
import jax.numpy as jnp
from jax.experimental import pallas as pl
from jax.experimental.pallas import tpu as pltpu


def _dice_sums_kernel(score_ref, label_ref, sums_ref,
                      acc_i_ref, acc_y_ref, acc_z_ref, *,
                      apply_softmax, hw_true, needs_mask):
    """Accumulate per-class [intersect, y_sum, z_sum] over HW tiles of one batch.

    score_ref : (C, TM)  predictions for this tile of pixels (native dtype)
    label_ref : (1, TM)  int32 class labels for this tile (-1 = padding)
    sums_ref  : (C, 3)   per-batch output, written on the last tile only
    acc_*_ref : (C, 1)   f32 VMEM scratch accumulators
    """
    i = pl.program_id(1)

    @pl.when(i == 0)
    def _():
        acc_i_ref[...] = jnp.zeros_like(acc_i_ref)
        acc_y_ref[...] = jnp.zeros_like(acc_y_ref)
        acc_z_ref[...] = jnp.zeros_like(acc_z_ref)

    score = score_ref[...].astype(jnp.float32)      # (C, TM), upcast after load
    labels = label_ref[...]                         # (1, TM) int32
    c, tm = score.shape

    if apply_softmax:
        # softmax over the class (sublane) axis, per pixel column
        mx = jnp.max(score, axis=0, keepdims=True)
        e = jnp.exp(score - mx)
        denom = jnp.sum(e, axis=0, keepdims=True)
        score = e * pl.reciprocal(denom, approx=True)

    if needs_mask:
        # zero out padded lanes (only relevant in the last tile); this keeps
        # z_sum correct in the softmax path where padded columns are not zero.
        lane = jax.lax.broadcasted_iota(jnp.int32, (1, tm), 1)
        valid = (i * tm + lane) < hw_true           # (1, TM)
        score = jnp.where(valid, score, 0.0)

    # one-hot encode: t[k, p] = (label[p] == k); padded labels are -1 -> all 0
    class_ids = jax.lax.broadcasted_iota(jnp.int32, (c, tm), 0)
    t = (labels == class_ids).astype(jnp.float32)   # (C, TM)

    acc_i_ref[...] += jnp.sum(score * t, axis=1, keepdims=True)      # intersect
    acc_y_ref[...] += jnp.sum(t, axis=1, keepdims=True)              # t*t == t
    acc_z_ref[...] += jnp.sum(score * score, axis=1, keepdims=True)  # z_sum

    @pl.when(i == pl.num_programs(1) - 1)
    def _():
        sums_ref[...] = jnp.concatenate(
            [acc_i_ref[...], acc_y_ref[...], acc_z_ref[...]], axis=1)


def dice_loss(inputs, target, n_classes, weight=None, softmax=False, tm=8192):
    """Pallas DiceLoss forward.

    inputs: (N, C, H, W) float32/bfloat16 predictions (logits if softmax=True)
    target: (N, 1, H, W) integer (or float-valued) class labels in [0, n_classes)
    Returns a scalar float32 loss matching the PyTorch module (ignore=None).
    """
    n, c, h, w = inputs.shape
    assert c == n_classes, "predict & target shape do not match"
    hw = h * w

    # Contiguous reshapes only -- no HBM relayout.
    score_ncm = inputs.reshape(n, c, hw)
    labels_n1m = target.reshape(n, 1, hw).astype(jnp.int32)

    # Tile size: largest 128-aligned tile that (a) fits the data, (b) stays
    # under a conservative ~8 MiB double-buffered input budget so defaults
    # remain within the scoped-VMEM limit on v5e / v6e / v7x.
    itemsize = jnp.dtype(inputs.dtype).itemsize
    tm_budget = (8 << 20) // (2 * (c * itemsize + 4))
    tm_budget = max(128, (tm_budget // 128) * 128)
    hw_up = pl.cdiv(hw, 128) * 128
    tm_eff = max(128, (min(tm, tm_budget, hw_up) // 128) * 128)

    m_pad = pl.cdiv(hw, tm_eff) * tm_eff
    needs_mask = m_pad != hw
    if needs_mask:
        score_ncm = jnp.pad(score_ncm, ((0, 0), (0, 0), (0, m_pad - hw)))
        labels_n1m = jnp.pad(labels_n1m, ((0, 0), (0, 0), (0, m_pad - hw)),
                             constant_values=-1)

    grid = (n, m_pad // tm_eff)

    kernel = functools.partial(
        _dice_sums_kernel,
        apply_softmax=softmax, hw_true=hw, needs_mask=needs_mask)

    cost = pl.CostEstimate(
        flops=6 * n * c * m_pad,
        transcendentals=(n * c * m_pad) if softmax else 0,
        bytes_accessed=n * c * m_pad * itemsize + n * m_pad * 4 + n * c * 3 * 4,
    )

    sums = pl.pallas_call(
        kernel,
        out_shape=jax.ShapeDtypeStruct((n, c, 3), jnp.float32),
        grid_spec=pltpu.PrefetchScalarGridSpec(
            num_scalar_prefetch=0,
            grid=grid,
            in_specs=[
                pl.BlockSpec((None, c, tm_eff), lambda b, i: (b, 0, i)),
                pl.BlockSpec((None, 1, tm_eff), lambda b, i: (b, 0, i)),
            ],
            out_specs=pl.BlockSpec((None, c, 3), lambda b, i: (b, 0, 0)),
            scratch_shapes=[pltpu.VMEM((c, 1), jnp.float32)] * 3,
        ),
        compiler_params=pltpu.CompilerParams(
            dimension_semantics=("parallel", "arbitrary")),
        cost_estimate=cost,
    )(score_ncm, labels_n1m)

    # Reduce the per-batch partials, then the cheap scalar epilogue.
    sums = jnp.sum(sums, axis=0)                    # (C, 3)
    intersect = sums[:, 0]
    y_sum = sums[:, 1]
    z_sum = sums[:, 2]

    smooth = 1e-05
    dice = 1.0 - (2.0 * intersect + smooth) / (z_sum + y_sum + smooth)
    if weight is None:
        weight = jnp.ones((n_classes,), jnp.float32)
    else:
        weight = jnp.asarray(weight, jnp.float32)
    return jnp.sum(dice * weight) / n_classes


def _dice_loss_ref(inputs, target, n_classes, softmax=False):
    """Pure-JAX reference mirroring the PyTorch module (weight/ignore None)."""
    inputs = inputs.astype(jnp.float32)
    if softmax:
        inputs = jax.nn.softmax(inputs, axis=1)
    smooth = 1e-05
    loss = 0.0
    for i in range(n_classes):
        score = inputs[:, i]                                   # (N, H, W)
        t = (target[:, 0] == i).astype(jnp.float32)            # (N, H, W)
        intersect = jnp.sum(score * t)
        y_sum = jnp.sum(t * t)
        z_sum = jnp.sum(score * score)
        dice = 1.0 - (2.0 * intersect + smooth) / (z_sum + y_sum + smooth)
        loss = loss + dice
    return loss / n_classes


if __name__ == "__main__":
    key = jax.random.PRNGKey(0)
    k1, k2 = jax.random.split(key)

    # Default path (softmax=False), no padding needed (HW multiple of 128).
    N, C, H, W = 2, 4, 16, 16  # n_classes = 4
    inputs = jax.random.uniform(k1, (N, C, H, W), dtype=jnp.float32)
    target = jax.random.randint(k2, (N, 1, H, W), 0, C)

    loss = dice_loss(inputs, target, n_classes=C, softmax=False)
    loss = jax.block_until_ready(loss)
    ref = _dice_loss_ref(inputs, target, n_classes=C, softmax=False)
    assert jnp.allclose(loss, ref, rtol=1e-5, atol=1e-6), (loss, ref)

    # softmax=True with a non-128-multiple spatial size to exercise the
    # in-kernel padded-lane masking (approx reciprocal -> looser tolerance).
    k3, k4 = jax.random.split(k1)
    H2, W2 = 15, 15
    inputs2 = jax.random.normal(k3, (N, C, H2, W2), dtype=jnp.float32)
    target2 = jax.random.randint(k4, (N, 1, H2, W2), 0, C)
    loss2 = jax.block_until_ready(
        dice_loss(inputs2, target2, n_classes=C, softmax=True))
    ref2 = _dice_loss_ref(inputs2, target2, n_classes=C, softmax=True)
    assert jnp.allclose(loss2, ref2, rtol=2e-3, atol=1e-4), (loss2, ref2)

    print("KERNEL_OK")
</pallas_src>

<mosaic_0001>
module attributes {stable_mosaic.version = 11 : i64} {
  func.func @_dice_sums_kernel(%arg0: i32, %arg1: i32, %arg2: memref<1x4x256xf32, #tpu.memory_space<vmem>>, %arg3: memref<1x1x256xi32, #tpu.memory_space<vmem>>, %arg4: memref<1x4x3xf32, #tpu.memory_space<vmem>>, %arg5: memref<4x1xf32, #tpu.memory_space<vmem>>, %arg6: memref<4x1xf32, #tpu.memory_space<vmem>>, %arg7: memref<4x1xf32, #tpu.memory_space<vmem>>) attributes {dimension_semantics = [#tpu.dimension_semantics<parallel>, #tpu.dimension_semantics<arbitrary>], iteration_bounds = array<i64: 2, 1>, scalar_prefetch = 0 : i64, scratch_operands = 3 : i64, tpu.core_type = #tpu.core_type<tc>, window_params = [{transform_indices = @transform_0, window_bounds = array<i64: 1, 4, 256>}, {transform_indices = @transform_1, window_bounds = array<i64: 1, 1, 256>}, {transform_indices = @transform_2, window_bounds = array<i64: 1, 4, 3>}]} {
    %c0_i32 = arith.constant 0 : i32
    %0 = arith.cmpi eq, %arg1, %c0_i32 : i32
    %1 = arith.extui %0 : i1 to i32
    %c0_i32_0 = arith.constant 0 : i32
    %2 = arith.cmpi ne, %1, %c0_i32_0 : i32
    scf.if %2 {
      %cst_22 = arith.constant 0.000000e+00 : f32
      %32 = vector.broadcast %cst_22 : f32 to vector<4x1xf32>
      %c0_23 = arith.constant 0 : index
      %c0_24 = arith.constant 0 : index
      %33 = vector.load %arg5[%c0_23, %c0_24] : memref<4x1xf32, #tpu.memory_space<vmem>>, vector<4x1xf32>
      tpu.vector_store %arg5[%c0_23, %c0_24], %32 {strides = array<i32>} : memref<4x1xf32, #tpu.memory_space<vmem>>, vector<4x1xf32>,
      %cst_25 = arith.constant 0.000000e+00 : f32
      %34 = vector.broadcast %cst_25 : f32 to vector<4x1xf32>
      %c0_26 = arith.constant 0 : index
      %c0_27 = arith.constant 0 : index
      %35 = vector.load %arg6[%c0_26, %c0_27] : memref<4x1xf32, #tpu.memory_space<vmem>>, vector<4x1xf32>
      tpu.vector_store %arg6[%c0_26, %c0_27], %34 {strides = array<i32>} : memref<4x1xf32, #tpu.memory_space<vmem>>, vector<4x1xf32>,
      %cst_28 = arith.constant 0.000000e+00 : f32
      %36 = vector.broadcast %cst_28 : f32 to vector<4x1xf32>
      %c0_29 = arith.constant 0 : index
      %c0_30 = arith.constant 0 : index
      %37 = vector.load %arg7[%c0_29, %c0_30] : memref<4x1xf32, #tpu.memory_space<vmem>>, vector<4x1xf32>
      tpu.vector_store %arg7[%c0_29, %c0_30], %36 {strides = array<i32>} : memref<4x1xf32, #tpu.memory_space<vmem>>, vector<4x1xf32>,
    } else {
    }
    %c0 = arith.constant 0 : index
    %c0_1 = arith.constant 0 : index
    %c0_2 = arith.constant 0 : index
    %3 = vector.load %arg2[%c0, %c0_1, %c0_2] : memref<1x4x256xf32, #tpu.memory_space<vmem>>, vector<1x4x256xf32>
    %4 = vector.shape_cast %3 : vector<1x4x256xf32> to vector<4x256xf32>
    %c0_3 = arith.constant 0 : index
    %c0_4 = arith.constant 0 : index
    %c0_5 = arith.constant 0 : index
    %5 = vector.load %arg3[%c0_3, %c0_4, %c0_5] : memref<1x1x256xi32, #tpu.memory_space<vmem>>, vector<1x1x256xi32>
    %6 = vector.shape_cast %5 : vector<1x1x256xi32> to vector<1x256xi32>
    %7 = tpu.iota {dimensions = array<i32: 0>} : vector<4x256xi32>
    %8 = vector.broadcast %6 : vector<1x256xi32> to vector<4x256xi32>
    %9 = arith.cmpi eq, %8, %7 : vector<4x256xi32>
    %10 = arith.extui %9 : vector<4x256xi1> to vector<4x256xi32>
    %11 = arith.sitofp %10 : vector<4x256xi32> to vector<4x256xf32>
    %c0_6 = arith.constant 0 : index
    %c0_7 = arith.constant 0 : index
    %12 = vector.load %arg5[%c0_6, %c0_7] : memref<4x1xf32, #tpu.memory_space<vmem>>, vector<4x1xf32>
    %13 = arith.mulf %4, %11 : vector<4x256xf32>
    %cst = arith.constant dense<0.000000e+00> : vector<4xf32>
    %14 = vector.multi_reduction <add>, %13, %cst [1] : vector<4x256xf32> to vector<4xf32>
    %15 = vector.shape_cast %14 : vector<4xf32> to vector<4x1xf32>
    %16 = arith.addf %12, %15 : vector<4x1xf32>
    %c0_8 = arith.constant 0 : index
    %c0_9 = arith.constant 0 : index
    %17 = vector.load %arg5[%c0_8, %c0_9] : memref<4x1xf32, #tpu.memory_space<vmem>>, vector<4x1xf32>
    tpu.vector_store %arg5[%c0_8, %c0_9], %16 {strides = array<i32>} : memref<4x1xf32, #tpu.memory_space<vmem>>, vector<4x1xf32>,
    %c0_10 = arith.constant 0 : index
    %c0_11 = arith.constant 0 : index
    %18 = vector.load %arg6[%c0_10, %c0_11] : memref<4x1xf32, #tpu.memory_space<vmem>>, vector<4x1xf32>
    %cst_12 = arith.constant dense<0.000000e+00> : vector<4xf32>
    %19 = vector.multi_reduction <add>, %11, %cst_12 [1] : vector<4x256xf32> to vector<4xf32>
    %20 = vector.shape_cast %19 : vector<4xf32> to vector<4x1xf32>
    %21 = arith.addf %18, %20 : vector<4x1xf32>
    %c0_13 = arith.constant 0 : index
    %c0_14 = arith.constant 0 : index
    %22 = vector.load %arg6[%c0_13, %c0_14] : memref<4x1xf32, #tpu.memory_space<vmem>>, vector<4x1xf32>
    tpu.vector_store %arg6[%c0_13, %c0_14], %21 {strides = array<i32>} : memref<4x1xf32, #tpu.memory_space<vmem>>, vector<4x1xf32>,
    %c0_15 = arith.constant 0 : index
    %c0_16 = arith.constant 0 : index
    %23 = vector.load %arg7[%c0_15, %c0_16] : memref<4x1xf32, #tpu.memory_space<vmem>>, vector<4x1xf32>
    %24 = arith.mulf %4, %4 : vector<4x256xf32>
    %cst_17 = arith.constant dense<0.000000e+00> : vector<4xf32>
    %25 = vector.multi_reduction <add>, %24, %cst_17 [1] : vector<4x256xf32> to vector<4xf32>
    %26 = vector.shape_cast %25 : vector<4xf32> to vector<4x1xf32>
    %27 = arith.addf %23, %26 : vector<4x1xf32>
    %c0_18 = arith.constant 0 : index
    %c0_19 = arith.constant 0 : index
    %28 = vector.load %arg7[%c0_18, %c0_19] : memref<4x1xf32, #tpu.memory_space<vmem>>, vector<4x1xf32>
    tpu.vector_store %arg7[%c0_18, %c0_19], %27 {strides = array<i32>} : memref<4x1xf32, #tpu.memory_space<vmem>>, vector<4x1xf32>,
    %c0_i32_20 = arith.constant 0 : i32
    %29 = arith.cmpi eq, %arg1, %c0_i32_20 : i32
    %30 = arith.extui %29 : i1 to i32
    %c0_i32_21 = arith.constant 0 : i32
    %31 = arith.cmpi ne, %30, %c0_i32_21 : i32
    scf.if %31 {
      %c0_22 = arith.constant 0 : index
      %c0_23 = arith.constant 0 : index
      %32 = vector.load %arg5[%c0_22, %c0_23] : memref<4x1xf32, #tpu.memory_space<vmem>>, vector<4x1xf32>
      %c0_24 = arith.constant 0 : index
      %c0_25 = arith.constant 0 : index
      %33 = vector.load %arg6[%c0_24, %c0_25] : memref<4x1xf32, #tpu.memory_space<vmem>>, vector<4x1xf32>
      %c0_26 = arith.constant 0 : index
      %c0_27 = arith.constant 0 : index
      %34 = vector.load %arg7[%c0_26, %c0_27] : memref<4x1xf32, #tpu.memory_space<vmem>>, vector<4x1xf32>
      %35 = tpu.concatenate %32, %33, %34 in 1 : vector<4x1xf32>, vector<4x1xf32>, vector<4x1xf32> -> vector<4x3xf32>
      %c0_28 = arith.constant 0 : index
      %c0_29 = arith.constant 0 : index
      %c0_30 = arith.constant 0 : index
      %36 = vector.load %arg4[%c0_28, %c0_29, %c0_30] : memref<1x4x3xf32, #tpu.memory_space<vmem>>, vector<1x4x3xf32>
      %37 = vector.shape_cast %36 : vector<1x4x3xf32> to vector<4x3xf32>
      %38 = vector.shape_cast %35 : vector<4x3xf32> to vector<1x4x3xf32>
      tpu.vector_store %arg4[%c0_28, %c0_29, %c0_30], %38 {strides = array<i32>} : memref<1x4x3xf32, #tpu.memory_space<vmem>>, vector<1x4x3xf32>,
    } else {
    }
    return
  }
  func.func @transform_0(%arg0: i32, %arg1: i32) -> (i32, i32, i32) {
    %c0_i32 = arith.constant 0 : i32
    %c0_i32_0 = arith.constant 0 : i32
    return %arg0, %c0_i32, %arg1 : i32, i32, i32
  }
  func.func @transform_1(%arg0: i32, %arg1: i32) -> (i32, i32, i32) {
    %c0_i32 = arith.constant 0 : i32
    %c0_i32_0 = arith.constant 0 : i32
    return %arg0, %c0_i32, %arg1 : i32, i32, i32
  }
  func.func @transform_2(%arg0: i32, %arg1: i32) -> (i32, i32, i32) {
    %c0_i32 = arith.constant 0 : i32
    %c0_i32_0 = arith.constant 0 : i32
    %c0_i32_1 = arith.constant 0 : i32
    return %arg0, %c0_i32, %c0_i32_0 : i32, i32, i32
  }
}

</mosaic_0001>

<bundles_post_ra>
// kernel: tpu_custom_call.1
= control target key start
LH: loop header
LB: loop body
LE: loop exit
PB: predicated region body
PF: predicated region fallthrough
CT: control target
= control target key end

     0   :  { %7 = vsyncpa [#allocation6], 0  ;;  %s761_s0 = inlined_call_operand.hbm [shape: f32[2,4,256], index: 0, kind: input, shape index: {}]   ;;  %s762_s1 = inlined_call_operand.hbm [shape: s32[2,1,256], index: 1, kind: input, shape index: {}]   ;;  %s763_s2 = inlined_call_operand.vmem [shape: f32[2,4,3], index: 2, kind: output, shape index: {}]  }
   0x1   :  { %9 = vsyncpa [#allocation6 + $0x1], 0 }
   0x2   :  { %10 = vsyncpa [#allocation8], 0 }
   0x3   :  { %12 = vsyncpa [#allocation8 + $0x1], 0  ;;  %s621_s9 = smov 0   ;;  %s623_s10 = smov 0  }
   0x4   :  { %s625_s11 = smov 0   ;;  %s627_s12 = smov 0  }
   0x5   :  { %s629_s13 = smov 0   ;;  %s631_s14 = smov 0  }
   0x6 LB: > { %s406_s15 = sadd.s32 4294967295, %s599_s14   ;;  %s30_s16 = sadd.s32 1, %s595_s13  ;;  %s599_s14 = sphi %s631_s14, %s18_s14   ;;  %s595_s13 = sphi %s629_s13, %s772_s13   ;;  %s591_s12 = sphi %s627_s12, %s771_s12   ;;  %s587_s11 = sphi %s625_s11, %s770_s11   ;;  %s583_s10 = sphi %s623_s10, %s769_s10   ;;  %s579_s9 = sphi %s621_s9, %s768_s9  }
   0x7   : > { %p32_p0 = scmp.ge.s32.totalorder %s30_s16, 2  ;;  %s39_s17 = sadd.s32 1, %s587_s11 }
   0x8   : > { %p46_p1 = scmp.ne.s32.totalorder %s587_s11, %s583_s10  ;;  %p47_p2 = scmp.eq.s32.totalorder %s599_s14, 0 }
   0x9   : > { %s774_s16 = smov (%p32_p0, %s30_s16), 0  ;;  %p52_p4 = scmp.ne.s32.totalorder %s583_s10, %s579_s9 }
   0xa   : > { %p657_p3 = por %p47_p2, %p46_p1  ;;  %s34_s19 = ssub.s32 %s595_s13, %s774_s16 }
   0xb   : > { %p53_p5 = scmp.eq.s32.totalorder %s406_s15, 0  ;;  %p37_p6 = scmp.eq.s32.totalorder %s34_s19, 0 }
   0xc   : > { %p437_p8 = scmp.lt.s32.totalorder %s599_s14, 2  ;;  %s673_s22 = sand.u32 1, %s587_s11  }
   0xd   : > { %p664_p7 = por %p53_p5, %p52_p4  ;;  %s424_s23 = sshll.u32 %s595_s13, 7 }
   0xe   : > { %s670_s21 = scalar_select %p37_p6, %s587_s11, %s39_s17  }
   0xf   : > { %s410_s24 = sshll.u32 %s673_s22, 3  ;;  %s142_s27 = scalar_lea.hbm %s761_s0, %s424_s23 }
  0x10   : > { %s134_s28 = scalar_lea.vmem [#allocation5], %s410_s24  ;;  %p682_p9 = pnand %p437_p8, %p657_p3 }
  0x11   : > { %s144_s29 = sshll.u32 %s134_s28, 4  ;;  %p416_p10 = scmp.ge.s32.totalorder %s599_s14, 1  ;;  %s145_s29 = int_to_ptr.vmem [resolvable:$true] %s144_s29 }
  0x12   : > { %p170_p11 = scmp.lt.s32.totalorder %s599_s14, 3  ;;  %s131_s3 = scalar_lea.sflag [#allocation6], %s673_s22 }
  0x13   : > { %p491_p12 = pneg %p682_p9  ;;  %s502_s4 = scalar_lea.vmem %s145_s29, 128 }
  0x14   : > { %p503_p13 = scmp.ne.s32.totalorder %s145_s29, %s502_s4  ;;  %s601_s5 = smov [#allocation5]  }
  0x15   : > { %s507_s6 = sshll.u32 %s601_s5, 4  ;;  %s508_s6 = int_to_ptr.vmem [resolvable:$false] %s507_s6 }
  0x16   : > { %p505_p0 = pnand %p503_p13, %p491_p12  ;;  %s509_s7 = scalar_lea.vmem %s508_s6, 256 }
  0x17   : > { %p510_p2 = scmp.lt.s32.totalorder %s145_s29, %s508_s6  ;;  %p511_p3 = scmp.lt.s32.totalorder %s509_s7, %s502_s4 }
  0x18   : > { %p506_p1 = pneg %p505_p0 }
  0x19   : > { %p512_p4 = por %p511_p3, %p510_p2 }
  0x1b   : > { %p513_p5 = pnand %p512_p4, %p506_p1 }
  0x1d   : > { %516 = shalt.err (!%p513_p5)
}
  0x1e   : > { %433 = dma.hbm_to_vmem [thread:$0]  (!%p682_p9), %s142_s27, 128, %s145_s29, %s131_s3  }
  0x1f   : > { %p700_p6 = pnand %p416_p10, %p170_p11  ;;  %s413_s9 = sshll.u32 %s673_s22, 1 }
  0x20   : > { %s425_s15 = sshll.u32 %s595_s13, 5  ;;  %s155_s23 = scalar_lea.vmem [#allocation7], %s413_s9 }
  0x21   : > { %s163_s19 = scalar_lea.hbm %s762_s1, %s425_s15  ;;  %s165_s24 = sshll.u32 %s155_s23, 4  ;;  %s166_s24 = int_to_ptr.vmem [resolvable:$true] %s165_s24 }
  0x22   : > { %s152_s25 = scalar_lea.sflag [#allocation8], %s673_s22  ;;  %s530_s26 = scalar_lea.vmem %s166_s24, 32 }
  0x23   : > { %p531_p8 = scmp.ne.s32.totalorder %s166_s24, %s530_s26  ;;  %s602_s27 = smov [#allocation7]  }
  0x24   : > { %s535_s28 = sshll.u32 %s602_s27, 4  ;;  %s536_s28 = int_to_ptr.vmem [resolvable:$false] %s535_s28 }
  0x25   : > { %p533_p13 = pnand %p531_p8, %p491_p12  ;;  %s537_s29 = scalar_lea.vmem %s536_s28, 64 }
  0x26   : > { %p538_p10 = scmp.lt.s32.totalorder %s166_s24, %s536_s28  ;;  %p539_p11 = scmp.lt.s32.totalorder %s537_s29, %s530_s26 }
  0x27   : > { %p534_p0 = pneg %p533_p13 }
  0x28   : > { %p540_p1 = por %p539_p11, %p538_p10 }
  0x2a   : > { %p541_p2 = pnand %p540_p1, %p534_p0 }
  0x2c   : > { %544 = shalt.err (!%p541_p2)
}
  0x2d   : > { %436 = dma.hbm_to_vmem [thread:$0]  (!%p682_p9), %s163_s19, 32, %s166_s24, %s152_s25  }
  0x2e   : > { %174 = sbr.rel (%p700_p6) target bundleno = 337 (0x151), region = 28  ;;  %s176_s22 = sand.u32 (!%p700_p6), 1, %s583_s10  }
  0x2f   : > { %s417_s3 = sshll.u32 (!%p700_p6), %s176_s22, 3  ;;  %s177_s4 = scalar_lea.sflag (!%p700_p6), [#allocation6], %s176_s22 }
  0x30   : > { %s180_s5 = scalar_lea.vmem (!%p700_p6), [#allocation5], %s417_s3 }
  0x33   : > { %570 = dma.done.wait (%p664_p7), %s177_s4, 128  }
  0x34   : > { %572 = vsyncadd (%p664_p7), %s177_s4, 4294967168  ;;  %s418_s6 = sshll.u32 %s176_s22, 1  ;;  %s186_s7 = scalar_lea.sflag [#allocation8], %s176_s22 }
  0x35   : > { %s189_s9 = scalar_lea.vmem [#allocation7], %s418_s6 }
  0x36   : > { %574 = dma.done.wait (%p664_p7), %s186_s7, 32  }
  0x37   : > { %576 = vsyncadd (%p664_p7), %s186_s7, 4294967264  ;;  %v230_v0 = vlaneseq  ;;  %vm224_vm0 = vcmask 3072   ;;  %v603_v1 = vmov 0.0   ;;  %v229_v5 = vld [vmem:[%s189_s9] sm:$0x3]  ;;  %v228_v6 = vld [vmem:[%s180_s5] sm:$0xff] }
  0x38   : > { %226 = vst.msk [vmem:[#allocation3] sm:$0xf] %vm224_vm0, %v603_v1  ;;  %225 = vst.msk [vmem:[#allocation2] sm:$0xf] %vm224_vm0, %v603_v1  ;;  %v273_v9 = vmul.f32 %v228_v6, %v228_v6  ;;  %vm255_vm1 = vcmask 1043456   ;;  %s604_s20 = smov 1  }
  0x39   : > { %227 = vst.msk [vmem:[#allocation4] sm:$0xf] %vm224_vm0, %v603_v1  ;;  %v231_v2 = vshrl.u32 %v230_v0, 7  ;;  %s605_s30 = smov 2   ;;  %p216_p7 = scmp.lt.s32.totalorder %s591_s12, 1  ;;  %vm298_vm4 = vcmask 7168  }
  0x3a   : > { %v275_v10 = vcombine.high %v273_v9, %v273_v9  ;;  %v277_v13 = vsel %vm255_vm1, %v273_v9, 0.0  ;;  %vm300_vm5 = vcmask 15360   ;;  %vm302_vm6 = vcmask 19456  }
  0x3b   : > { %v234_v3 = vsub.s32 0, %v231_v2  ;;  %v238_v4 = vsub.s32 1, %v231_v2  ;;  %s776_s12 = smov (!%p216_p7, %s591_s12), 1 }
  0x3c   : > { %v278_v17 = vsel %vm255_vm1, %v275_v10, 0.0  ;;  %s419_s8 = sshll.u32 %s776_s12, 2 }
  0x3d   : > { %v235_v7 = vrot.slane %v229_v5, %v234_v3  ;;  %v239_v8 = vrot.slane %v229_v5, %v238_v4  ;;  %v279_v20 = vadd.f32 %v278_v17, %v277_v13  ;;  %s219_s18 = scalar_lea.vmem %s763_s2, %s419_s8 }
  0x3f   : > { %vm240_vm2 = vcmp.eq.s32.totalorder %v235_v7, %v231_v2  ;;  %vm241_vm3 = vcmp.eq.s32.totalorder %v239_v8, %v231_v2  ;;  %v264_v25 = vld [vmem:[#allocation3] sm:$0xf]  ;;  %v246_v30 = vld [vmem:[#allocation2] sm:$0xf] }
  0x40   : > { %v420_v11 = vsel %vm240_vm2, 1.0, %v603_v1  ;;  %v421_v12 = vsel %vm241_vm3, 1.0, %v603_v1  ;;  %v272_v28 = vld [vmem:[#allocation4] sm:$0xf] }
  0x41   : > { %v265_v14 = vsel %vm255_vm1, %v420_v11, 0.0  ;;  %v266_v15 = vsel %vm255_vm1, %v421_v12, 0.0  ;;  %v249_v16 = vcombine.low %v420_v11, %v421_v12 }
  0x42   : > { %v267_v18 = vadd.f32 %v266_v15, %v265_v14 }
  0x43   : > { %v251_v19 = vmul.f32 %v249_v16, %v228_v6 }
  0x44   : > { %268 = vadd.xlane.f32.xlu0 %v267_v18 }
  0x45   : > { %v253_v21 = vcombine.high %v251_v19, %v251_v19  ;;  %v256_v22 = vsel %vm255_vm1, %v251_v19, 0.0 }
  0x47   : > { %v257_v23 = vsel %vm255_vm1, %v253_v21, 0.0 }
  0x48   : > { %280 = vadd.xlane.f32.xlu0 %v279_v20  ;;  %v258_v24 = vadd.f32 %v257_v23, %v256_v22 }
  0x4a   : > { %259 = vadd.xlane.f32.xlu1 %v258_v24 }
  0xcd   : > { %v269_v26 = vpop.xlane.xlu0 %268 }
  0xce   : > { %v270_v27 = vadd.f32 %v269_v26, %v264_v25 }
  0xd0   : > { %271 = vst.msk [vmem:[#allocation3] sm:$0xf] %vm224_vm0, %v270_v27 }
  0xd1   : > { %v281_v29 = vpop.xlane.xlu0 %280 }
  0xd2   : > { %v282_v31 = vadd.f32 %v281_v29, %v272_v28 }
  0xd3   : > { %v260_v32 = vpop.xlane.xlu1 %259 }
  0xd4   : > { %283 = vst.msk [vmem:[#allocation4] sm:$0xf] %vm224_vm0, %v282_v31  ;;  %v261_v33 = vadd.f32 %v260_v32, %v246_v30 }
  0xd6   : > { %263 = vst.msk [vmem:[#allocation2] sm:$0xf] %vm224_vm0, %v261_v33 }
  0xd7   : > { %v288_v34 = vld [vmem:[#allocation3] sm:$0xf] }
  0xd8   : > { %291 = vrot.lane.b32.xlu1 %v288_v34, %s604_s20 }
  0xdb   : > { %v289_v35 = vld [vmem:[#allocation4] sm:$0xf] }
  0xdc   : > { %295 = vrot.lane.b32.xlu0 %v289_v35, %s605_s30 }
  0xdd   : > { %v287_v37 = vld [vmem:[#allocation2] sm:$0xf] }
 0x14a   : > { %v292_v36 = vpop.permute.xlu1 %291 }
 0x14b   : > { %v299_v38 = vsel %vm298_vm4, %v287_v37, %v292_v36 }
 0x14e   : > { %v296_v39 = vpop.permute.xlu0 %295 }
 0x14f   : > { %v301_v40 = vsel %vm300_vm5, %v299_v38, %v296_v39 }
 0x150   : > { %303 = vst.msk [vmem:[%s219_s18] sm:$0xf] %vm302_vm6, %v301_v40 }
 0x151 PF: > { %s18_s14 = sadd.s32 1, %s599_s14   ;;  %s768_s9 = smov %s583_s10 }
 0x152   : > { %p15_p9 = scmp.ge.s32.totalorder %s18_s14, 4   ;;  %s769_s10 = smov %s587_s11 }
 0x153   : > { %s770_s11 = smov %s670_s21  ;;  %s771_s12 = smov %s595_s13 }
 0x154   : > { %s772_s13 = smov %s774_s16  ;;  %17 = sbr.rel (!%p15_p9) target bundleno = 6 (0x6), region = 89 }
 0x159   :  { %323 = vsyncpa [#allocation6], 1 }
 0x15a   :  { %325 = vsyncpa [#allocation6 + $0x1], 1 }
 0x15b   :  { %326 = vsyncpa [#allocation8], 1 }
 0x15c   :  { %328 = vsyncpa [#allocation8 + $0x1], 1 }

</bundles_post_ra>
